<compile_context>
chip_gen: v5e
topology: v5e:2x2
jax: 0.10.0
libtpu: 0.0.40
codegen_flags: <defaults>
</compile_context>

<pallas_src>
import jax
import jax.numpy as jnp
from jax.experimental import pallas as pl
from jax.experimental.pallas import tpu as pltpu


def _round_up(x, m):
    return (x + m - 1) // m * m


def actor_mlp_kernel(x_ref, w1_ref, b1_ref, w2_ref, b2_ref, w3_ref, b3_ref,
                     out_ref):
    # x_ref: (TM, state_dim) bf16 tile of the batch.
    # fc1 + ReLU  (bf16 MXU matmul, f32 accumulation, f32 epilogue)
    h1 = jnp.dot(x_ref[...], w1_ref[...], preferred_element_type=jnp.float32)
    h1 = jnp.maximum(h1 + b1_ref[...], 0.0).astype(jnp.bfloat16)

    # fc2 + ReLU
    h2 = jnp.dot(h1, w2_ref[...], preferred_element_type=jnp.float32)
    h2 = jnp.maximum(h2 + b2_ref[...], 0.0).astype(jnp.bfloat16)

    # fc3 + tanh  (output columns are padded to a lane-dense 128)
    h3 = jnp.dot(h2, w3_ref[...], preferred_element_type=jnp.float32)
    out_ref[...] = jnp.tanh(h3 + b3_ref[...]).astype(out_ref.dtype)


def actor_forward(state, params, *, tm=128):
    """state: (B, state_dim) f32. params: dict of f32 w1,b1,w2,b2,w3,b3."""
    w1, b1 = params["w1"], params["b1"]
    w2, b2 = params["w2"], params["b2"]
    w3, b3 = params["w3"], params["b3"]

    B, state_dim = state.shape
    hidden = w1.shape[1]
    action_dim = w3.shape[1]

    # ---- pad to TPU-friendly shapes -----------------------------------
    # Batch: full MXU M-tile for large B, else round up to bf16 sublane pack.
    TM = tm if B >= tm else _round_up(max(B, 1), 16)
    Bp = _round_up(B, TM)
    # Output columns: lane-dense (multiple of 128) so stores are unmasked.
    Np = _round_up(max(action_dim, 128), 128)

    x_p = jnp.zeros((Bp, state_dim), jnp.bfloat16).at[:B].set(
        state.astype(jnp.bfloat16))
    w1_b = w1.astype(jnp.bfloat16)
    w2_b = w2.astype(jnp.bfloat16)
    w3_p = jnp.zeros((hidden, Np), jnp.bfloat16).at[:, :action_dim].set(
        w3.astype(jnp.bfloat16))
    b1_f = b1.astype(jnp.float32)
    b2_f = b2.astype(jnp.float32)
    b3_p = jnp.zeros((1, Np), jnp.float32).at[:, :action_dim].set(
        b3.astype(jnp.float32))

    grid = (Bp // TM,)

    # Weights / biases: constant block index -> stay VMEM-resident across the
    # batch grid. Activations: tiled over the batch axis.
    def const(shape):
        return pl.BlockSpec(shape, lambda i: (0, 0))

    out_p = pl.pallas_call(
        actor_mlp_kernel,
        out_shape=jax.ShapeDtypeStruct((Bp, Np), jnp.float32),
        grid=grid,
        in_specs=[
            pl.BlockSpec((TM, state_dim), lambda i: (i, 0)),  # x tile
            const((state_dim, hidden)),                       # w1 (resident)
            const((1, hidden)),                               # b1
            const((hidden, hidden)),                          # w2
            const((1, hidden)),                               # b2
            const((hidden, Np)),                              # w3 (padded)
            const((1, Np)),                                   # b3 (padded)
        ],
        out_specs=pl.BlockSpec((TM, Np), lambda i: (i, 0)),
        compiler_params=pltpu.CompilerParams(
            dimension_semantics=("parallel",)),
    )(x_p, w1_b, b1_f, w2_b, b2_f, w3_p, b3_p)

    # TODO(synk): for persistent tiny-batch serving, keep weights resident
    # across calls (cross-pallas_call prefetch) instead of re-passing them.
    return out_p[:B, :action_dim]


def init_actor_params(key, state_dim, action_dim, hidden=256):
    """Deterministic synthetic init (PyTorch-Linear-style uniform bounds)."""
    ks = jax.random.split(key, 6)

    def lin(kw, kb, fan_in, fan_out):
        bound = 1.0 / jnp.sqrt(fan_in)
        w = jax.random.uniform(kw, (fan_in, fan_out), jnp.float32,
                               minval=-bound, maxval=bound)
        b = jax.random.uniform(kb, (1, fan_out), jnp.float32,
                               minval=-bound, maxval=bound)
        return w, b

    w1, b1 = lin(ks[0], ks[1], state_dim, hidden)
    w2, b2 = lin(ks[2], ks[3], hidden, hidden)
    w3, b3 = lin(ks[4], ks[5], hidden, action_dim)
    return {"w1": w1, "b1": b1, "w2": w2, "b2": b2, "w3": w3, "b3": b3}


def actor_forward_ref(state, p):
    """Reference with the same bf16-operand / f32-accumulate numerics."""
    x = state.astype(jnp.bfloat16)
    h1 = jnp.maximum(
        jnp.dot(x, p["w1"].astype(jnp.bfloat16),
                preferred_element_type=jnp.float32) + p["b1"], 0.0
    ).astype(jnp.bfloat16)
    h2 = jnp.maximum(
        jnp.dot(h1, p["w2"].astype(jnp.bfloat16),
                preferred_element_type=jnp.float32) + p["b2"], 0.0
    ).astype(jnp.bfloat16)
    h3 = jnp.dot(h2, p["w3"].astype(jnp.bfloat16),
                 preferred_element_type=jnp.float32) + p["b3"]
    return jnp.tanh(h3)


if __name__ == "__main__":
    key = jax.random.PRNGKey(0)
    k_param, k_state = jax.random.split(key)

    batch = 2
    state_dim = 32
    action_dim = 8

    params = init_actor_params(k_param, state_dim, action_dim)
    state = jax.random.normal(k_state, (batch, state_dim), jnp.float32)

    out = jax.block_until_ready(actor_forward(state, params))
    ref = jax.block_until_ready(actor_forward_ref(state, params))
    ref_f32 = jax.block_until_ready(
        jnp.tanh(
            jnp.maximum(
                jnp.maximum(state @ params["w1"] + params["b1"], 0.0)
                @ params["w2"] + params["b2"], 0.0)
            @ params["w3"] + params["b3"]))

    assert out.shape == (batch, action_dim)
    # Tight check vs the bf16-matched reference.
    assert jnp.allclose(out, ref, atol=1e-2, rtol=1e-2), (
        f"max abs err vs bf16 ref: {jnp.max(jnp.abs(out - ref))}")
    # Loose sanity check vs the pure-f32 PyTorch-equivalent forward.
    assert jnp.allclose(out, ref_f32, atol=5e-2, rtol=5e-2), (
        f"max abs err vs f32 ref: {jnp.max(jnp.abs(out - ref_f32))}")

    print("KERNEL_OK")
</pallas_src>

<mosaic_0001>
module attributes {stable_mosaic.version = 11 : i64} {
  func.func @actor_mlp_kernel(%arg0: i32, %arg1: memref<16x32xbf16, #tpu.memory_space<vmem>>, %arg2: memref<32x256xbf16, #tpu.memory_space<vmem>>, %arg3: memref<1x256xf32, #tpu.memory_space<vmem>>, %arg4: memref<256x256xbf16, #tpu.memory_space<vmem>>, %arg5: memref<1x256xf32, #tpu.memory_space<vmem>>, %arg6: memref<256x128xbf16, #tpu.memory_space<vmem>>, %arg7: memref<1x128xf32, #tpu.memory_space<vmem>>, %arg8: memref<16x128xf32, #tpu.memory_space<vmem>>) attributes {dimension_semantics = [#tpu.dimension_semantics<parallel>], iteration_bounds = array<i64: 1>, scalar_prefetch = 0 : i64, scratch_operands = 0 : i64, tpu.core_type = #tpu.core_type<tc>, window_params = [{transform_indices = @transform_0, window_bounds = array<i64: 16, 32>}, {pipeline_mode = #tpu.pipeline_mode<synchronous>, transform_indices = @transform_1, window_bounds = array<i64: 32, 256>}, {pipeline_mode = #tpu.pipeline_mode<synchronous>, transform_indices = @transform_2, window_bounds = array<i64: 1, 256>}, {pipeline_mode = #tpu.pipeline_mode<synchronous>, transform_indices = @transform_3, window_bounds = array<i64: 256, 256>}, {pipeline_mode = #tpu.pipeline_mode<synchronous>, transform_indices = @transform_4, window_bounds = array<i64: 1, 256>}, {pipeline_mode = #tpu.pipeline_mode<synchronous>, transform_indices = @transform_5, window_bounds = array<i64: 256, 128>}, {pipeline_mode = #tpu.pipeline_mode<synchronous>, transform_indices = @transform_6, window_bounds = array<i64: 1, 128>}, {transform_indices = @transform_7, window_bounds = array<i64: 16, 128>}]} {
    %c0 = arith.constant 0 : index
    %c0_0 = arith.constant 0 : index
    %0 = vector.load %arg1[%c0, %c0_0] : memref<16x32xbf16, #tpu.memory_space<vmem>>, vector<16x32xbf16>
    %c0_1 = arith.constant 0 : index
    %c0_2 = arith.constant 0 : index
    %1 = vector.load %arg2[%c0_1, %c0_2] : memref<32x256xbf16, #tpu.memory_space<vmem>>, vector<32x256xbf16>
    %cst = arith.constant dense<0.000000e+00> : vector<16x256xf32>
    %2 = tpu.matmul %0, %1, %cst {dimension_numbers = #tpu.dot_dimension_numbers<[1], [0], [0], [1], [0, 0, 1, 1], [], []>} : vector<16x32xbf16>, vector<32x256xbf16>, vector<16x256xf32> -> vector<16x256xf32>
    %c0_3 = arith.constant 0 : index
    %c0_4 = arith.constant 0 : index
    %3 = vector.load %arg3[%c0_3, %c0_4] : memref<1x256xf32, #tpu.memory_space<vmem>>, vector<1x256xf32>
    %4 = vector.broadcast %3 : vector<1x256xf32> to vector<16x256xf32>
    %5 = arith.addf %2, %4 : vector<16x256xf32>
    %cst_5 = arith.constant 0.000000e+00 : f32
    %6 = vector.broadcast %cst_5 : f32 to vector<16x256xf32>
    %7 = arith.maximumf %5, %6 : vector<16x256xf32>
    %8 = arith.truncf %7 : vector<16x256xf32> to vector<16x256xbf16>
    %c0_6 = arith.constant 0 : index
    %c0_7 = arith.constant 0 : index
    %9 = vector.load %arg4[%c0_6, %c0_7] : memref<256x256xbf16, #tpu.memory_space<vmem>>, vector<256x256xbf16>
    %cst_8 = arith.constant dense<0.000000e+00> : vector<16x256xf32>
    %10 = tpu.matmul %8, %9, %cst_8 {dimension_numbers = #tpu.dot_dimension_numbers<[1], [0], [0], [1], [0, 0, 1, 1], [], []>} : vector<16x256xbf16>, vector<256x256xbf16>, vector<16x256xf32> -> vector<16x256xf32>
    %c0_9 = arith.constant 0 : index
    %c0_10 = arith.constant 0 : index
    %11 = vector.load %arg5[%c0_9, %c0_10] : memref<1x256xf32, #tpu.memory_space<vmem>>, vector<1x256xf32>
    %12 = vector.broadcast %11 : vector<1x256xf32> to vector<16x256xf32>
    %13 = arith.addf %10, %12 : vector<16x256xf32>
    %cst_11 = arith.constant 0.000000e+00 : f32
    %14 = vector.broadcast %cst_11 : f32 to vector<16x256xf32>
    %15 = arith.maximumf %13, %14 : vector<16x256xf32>
    %16 = arith.truncf %15 : vector<16x256xf32> to vector<16x256xbf16>
    %c0_12 = arith.constant 0 : index
    %c0_13 = arith.constant 0 : index
    %17 = vector.load %arg6[%c0_12, %c0_13] : memref<256x128xbf16, #tpu.memory_space<vmem>>, vector<256x128xbf16>
    %cst_14 = arith.constant dense<0.000000e+00> : vector<16x128xf32>
    %18 = tpu.matmul %16, %17, %cst_14 {dimension_numbers = #tpu.dot_dimension_numbers<[1], [0], [0], [1], [0, 0, 1, 1], [], []>} : vector<16x256xbf16>, vector<256x128xbf16>, vector<16x128xf32> -> vector<16x128xf32>
    %c0_15 = arith.constant 0 : index
    %c0_16 = arith.constant 0 : index
    %19 = vector.load %arg7[%c0_15, %c0_16] : memref<1x128xf32, #tpu.memory_space<vmem>>, vector<1x128xf32>
    %20 = vector.broadcast %19 : vector<1x128xf32> to vector<16x128xf32>
    %21 = arith.addf %18, %20 : vector<16x128xf32>
    %22 = math.tanh %21 : vector<16x128xf32>
    %c0_17 = arith.constant 0 : index
    %c0_18 = arith.constant 0 : index
    %23 = vector.load %arg8[%c0_17, %c0_18] : memref<16x128xf32, #tpu.memory_space<vmem>>, vector<16x128xf32>
    tpu.vector_store %arg8[%c0_17, %c0_18], %22 {strides = array<i32>} : memref<16x128xf32, #tpu.memory_space<vmem>>, vector<16x128xf32>,
    return
  }
  func.func @transform_0(%arg0: i32) -> (i32, i32) {
    %c0_i32 = arith.constant 0 : i32
    %c0_i32_0 = arith.constant 0 : i32
    return %arg0, %c0_i32 : i32, i32
  }
  func.func @transform_1(%arg0: i32) -> (i32, i32) {
    %c0_i32 = arith.constant 0 : i32
    %c0_i32_0 = arith.constant 0 : i32
    %c0_i32_1 = arith.constant 0 : i32
    return %c0_i32, %c0_i32_0 : i32, i32
  }
  func.func @transform_2(%arg0: i32) -> (i32, i32) {
    %c0_i32 = arith.constant 0 : i32
    %c0_i32_0 = arith.constant 0 : i32
    %c0_i32_1 = arith.constant 0 : i32
    return %c0_i32, %c0_i32_0 : i32, i32
  }
  func.func @transform_3(%arg0: i32) -> (i32, i32) {
    %c0_i32 = arith.constant 0 : i32
    %c0_i32_0 = arith.constant 0 : i32
    %c0_i32_1 = arith.constant 0 : i32
    return %c0_i32, %c0_i32_0 : i32, i32
  }
  func.func @transform_4(%arg0: i32) -> (i32, i32) {
    %c0_i32 = arith.constant 0 : i32
    %c0_i32_0 = arith.constant 0 : i32
    %c0_i32_1 = arith.constant 0 : i32
    return %c0_i32, %c0_i32_0 : i32, i32
  }
  func.func @transform_5(%arg0: i32) -> (i32, i32) {
    %c0_i32 = arith.constant 0 : i32
    %c0_i32_0 = arith.constant 0 : i32
    %c0_i32_1 = arith.constant 0 : i32
    return %c0_i32, %c0_i32_0 : i32, i32
  }
  func.func @transform_6(%arg0: i32) -> (i32, i32) {
    %c0_i32 = arith.constant 0 : i32
    %c0_i32_0 = arith.constant 0 : i32
    %c0_i32_1 = arith.constant 0 : i32
    return %c0_i32, %c0_i32_0 : i32, i32
  }
  func.func @transform_7(%arg0: i32) -> (i32, i32) {
    %c0_i32 = arith.constant 0 : i32
    %c0_i32_0 = arith.constant 0 : i32
    return %arg0, %c0_i32 : i32, i32
  }
}

</mosaic_0001>

<bundles_post_ra>
// kernel: tpu_custom_call.1
= control target key start
LH: loop header
LB: loop body
LE: loop exit
PB: predicated region body
PF: predicated region fallthrough
CT: control target
= control target key end

     0   :  { %12 = vsyncpa [#allocation3], 0  ;;  %s1143_s0 = inlined_call_operand.hbm [shape: bf16[16,32], index: 0, kind: input, shape index: {}]   ;;  %s1144_s1 = inlined_call_operand.hbm [shape: bf16[32,256], index: 1, kind: input, shape index: {}]   ;;  %s1145_s2 = inlined_call_operand.hbm [shape: f32[1,256], index: 2, kind: input, shape index: {}]   ;;  %s1146_s3 = inlined_call_operand.hbm [shape: bf16[256,256], index: 3, kind: input, shape index: {}]   ;;  %s1147_s4 = inlined_call_operand.vmem [shape: f32[1,256], index: 4, kind: input, shape index: {}]   ;;  %s1148_s5 = inlined_call_operand.hbm [shape: bf16[256,128], index: 5, kind: input, shape index: {}]   ;;  %s1149_s6 = inlined_call_operand.vmem [shape: f32[1,128], index: 6, kind: input, shape index: {}]   ;;  %s1150_s7 = inlined_call_operand.hbm [shape: f32[16,128], index: 7, kind: output, shape index: {}]  }
   0x1   :  { %13 = vsyncpa [#allocation6], 0 }
   0x2   :  { %14 = vsyncpa [#allocation9], 0  ;;  %s33_s26 = sshll.u32 %s1144_s1, 4  ;;  %s34_s26 = int_to_ptr.hbm [resolvable:$true] %s33_s26 }
   0x3   :  { %15 = vsyncpa [#allocation4], 0  ;;  %s1058_s27 = smov [#allocation5]   ;;  %s57_s8 = sshll.u32 %s1146_s3, 4  ;;  %s58_s8 = int_to_ptr.hbm [resolvable:$true] %s57_s8 }
   0x4   :  { %s35_s28 = sshll.u32 %s1058_s27, 4  ;;  %s1059_s9 = smov 128   ;;  %s36_s28 = int_to_ptr.vmem [resolvable:$true] %s35_s28 }
   0x5   :  { %s1060_s10 = smov 8   ;;  %s1061_s11 = smov [#allocation8]  }
   0x6   :  { %41 = dma.hbm_to_vmem [thread:$0]  %s34_s26, 512, %s36_s28, [#allocation6], %s1059_s9, %s1059_s9, %s1060_s10  }
   0x7   :  { %s59_s12 = sshll.u32 %s1061_s11, 4  ;;  %s20_s14 = sshll.u32 %s1143_s0, 4  ;;  %s60_s12 = int_to_ptr.vmem [resolvable:$true] %s59_s12  ;;  %s21_s14 = int_to_ptr.hbm [resolvable:$true] %s20_s14 }
   0x8   :  { %65 = dma.hbm_to_vmem [thread:$0]  %s58_s8, 4096, %s60_s12, [#allocation9], %s1059_s9, %s1059_s9, %s1060_s10  }
   0x9   :  { %s1062_s3 = smov [#allocation2]   ;;  %s47_s18 = sshll.u32 %s1145_s2, 4  ;;  %s48_s18 = int_to_ptr.hbm [resolvable:$true] %s47_s18 }
   0xa   :  { %s22_s15 = sshll.u32 %s1062_s3, 4  ;;  %s1063_s19 = smov 64   ;;  %s23_s15 = int_to_ptr.vmem [resolvable:$true] %s22_s15 }
   0xb   :  { %s1064_s20 = smov 4   ;;  %s1065_s21 = smov [#allocation7]  }
   0xc   :  { %28 = dma.hbm_to_vmem [thread:$0]  %s21_s14, 128, %s23_s15, [#allocation3], %s1063_s19, %s1063_s19, %s1064_s20  }
   0xd   :  { %s49_s22 = sshll.u32 %s1065_s21, 4  ;;  %s72_s24 = sshll.u32 %s1148_s5, 4  ;;  %s50_s22 = int_to_ptr.vmem [resolvable:$true] %s49_s22  ;;  %s73_s24 = int_to_ptr.hbm [resolvable:$true] %s72_s24 }
   0xe   :  { %52 = dma.hbm_to_vmem [thread:$0]  %s48_s18, 32, %s50_s22, [#allocation6]  }
   0xf   :  { %s1066_s25 = smov [#allocation10]  }
  0x10   :  { %s74_s26 = sshll.u32 %s1066_s25, 4  ;;  %s75_s26 = int_to_ptr.vmem [resolvable:$true] %s74_s26 }
  0x11   :  { %80 = dma.hbm_to_vmem [thread:$0]  %s73_s24, 2048, %s75_s26, [#allocation9], %s1063_s19, %s1063_s19, %s1064_s20  }
  0x12   :  { %1050 = dma.done.wait [#allocation3], 128  }
  0x13   :  { %1051 = vsyncadd [#allocation3], 4294967168 }
  0x14   :  { %1052 = dma.done.wait [#allocation6], 544  }
  0x15   :  { %1053 = vsyncadd [#allocation6], 4294966752 }
  0x16   :  { %1054 = dma.done.wait [#allocation9], 6144  }
  0x17   :  { %1055 = vsyncadd [#allocation9], 4294961152  ;;  %v638_v0 = vld [vmem:[#allocation5 + $0x10] sm:$0xf]  ;;  %v842_v1 = vld [vmem:[#allocation5 + $0x14] sm:$0xf0] }
  0x18   :  { %v841_v2 = vld [vmem:[#allocation5 + $0x14] sm:$0xf]  ;;  %v639_v3 = vor.u32 %v842_v1, %v638_v0  ;;  %v640_v4 = vld [vmem:[#allocation5 + $0x18] sm:$0xf0]  ;;  %v630_v5 = vld [vmem:[#allocation5] sm:$0xf] }
  0x19   :  { %v840_v6 = vld [vmem:[#allocation5 + $0x4] sm:$0xf0]  ;;  %v643_v7 = vor.u32 %v841_v2, %v640_v4  ;;  %v839_v8 = vld [vmem:[#allocation5 + $0x4] sm:$0xf]  ;;  %v632_v9 = vld [vmem:[#allocation5 + $0x8] sm:$0xf0] }
  0x1a   :  { %vm141_vm0 = vcmask 261120   ;;  %151 = vmatpush.bf16.msra.mxu0 %v639_v3  ;;  %v631_v10 = vor.u32 %v840_v6, %v630_v5  ;;  %v704_v11 = vld [vmem:[#allocation8 + $0x70] sm:$0xf]  ;;  %v858_v12 = vld [vmem:[#allocation8 + $0x74] sm:$0xf0]  ;;  %v635_v14 = vor.u32 %v839_v8, %v632_v9  ;;  %s1067_s28 = smov [#allocation11]  }
  0x1b   :  { %v768_v13 = vld [vmem:[#allocation8 + $0xf0] sm:$0xf]  ;;  %165 = vmatpush.bf16.msra.mxu1 %v643_v7  ;;  %v838_v15 = vld [vmem:[#allocation2] sm:$0xff]  ;;  %v705_v16 = vor.u32 %v858_v12, %v704_v11  ;;  %v696_v24 = vld [vmem:[#allocation8 + $0x60] sm:$0xf]  ;;  %s607_s29 = sshll.u32 %s1067_s28, 4  ;;  %s608_s29 = int_to_ptr.vmem [resolvable:$true] %s607_s29 }
  0x1c   :  { %v874_v17 = vld [vmem:[#allocation8 + $0xf4] sm:$0xf0]  ;;  %v857_v18 = vld [vmem:[#allocation8 + $0x74] sm:$0xf]  ;;  %v706_v19 = vld [vmem:[#allocation8 + $0x78] sm:$0xf0] }
  0x1d   :  { %v769_v20 = vor.u32 %v874_v17, %v768_v13  ;;  %v709_v21 = vor.u32 %v857_v18, %v706_v19  ;;  %v873_v22 = vld [vmem:[#allocation8 + $0xf4] sm:$0xf]  ;;  %v770_v23 = vld [vmem:[#allocation8 + $0xf8] sm:$0xf0]  ;;  %377 = vmatpush.bf16.msra.mxu2 %v705_v16  ;;  %v856_v26 = vld [vmem:[#allocation8 + $0x64] sm:$0xf0] }
  0x1e   :  { %v773_v25 = vor.u32 %v873_v22, %v770_v23  ;;  %v760_v27 = vld [vmem:[#allocation8 + $0xe0] sm:$0xf]  ;;  %v872_v28 = vld [vmem:[#allocation8 + $0xe4] sm:$0xf0]  ;;  %152 = vmatpush.bf16.msra.mxu0 %v631_v10  ;;  %v697_v29 = vor.u32 %v856_v26, %v696_v24  ;;  %v855_v31 = vld [vmem:[#allocation8 + $0x64] sm:$0xf] }
  0x1f   :  { %391 = vmatpush.bf16.msra.mxu3 %v769_v20  ;;  %v761_v30 = vor.u32 %v872_v28, %v760_v27  ;;  %v698_v32 = vld [vmem:[#allocation8 + $0x68] sm:$0xf0]  ;;  %v871_v33 = vld [vmem:[#allocation8 + $0xe4] sm:$0xf]  ;;  %166 = vmatpush.bf16.msra.mxu1 %v635_v14  ;;  %v688_v36 = vld [vmem:[#allocation8 + $0x50] sm:$0xf] }
  0x20   :  { %v701_v34 = vor.u32 %v855_v31, %v698_v32  ;;  %v762_v35 = vld [vmem:[#allocation8 + $0xe8] sm:$0xf0]  ;;  %v854_v37 = vld [vmem:[#allocation8 + $0x54] sm:$0xf0]  ;;  %v752_v39 = vld [vmem:[#allocation8 + $0xd0] sm:$0xf] }
  0x21   :  { %v765_v38 = vor.u32 %v871_v33, %v762_v35  ;;  %v870_v40 = vld [vmem:[#allocation8 + $0xd4] sm:$0xf0]  ;;  %v853_v41 = vld [vmem:[#allocation8 + $0x54] sm:$0xf]  ;;  %644 = vmatmul.msk.bf16.vlgmr.msra.gmra.mxu0 %vm141_vm0, %v838_v15  ;;  %378 = vmatpush.bf16.msra.mxu2 %v697_v29  ;;  %v689_v42 = vor.u32 %v854_v37, %v688_v36  ;;  %v690_v43 = vld [vmem:[#allocation8 + $0x58] sm:$0xf0] }
  0x22   :  { %405 = vmatpush.bf16.msrb.mxu0 %v709_v21  ;;  %v869_v44 = vld [vmem:[#allocation8 + $0xd4] sm:$0xf]  ;;  %v754_v45 = vld [vmem:[#allocation8 + $0xd8] sm:$0xf0]  ;;  %645 = vmatmul.msk.bf16.vlgmr.msra.gmra.mxu1 %vm141_vm0, %v838_v15  ;;  %v753_v46 = vor.u32 %v870_v40, %v752_v39  ;;  %v680_v47 = vld [vmem:[#allocation8 + $0x40] sm:$0xf]  ;;  %v693_v49 = vor.u32 %v853_v41, %v690_v43 }
  0x23   :  { %419 = vmatpush.bf16.msrb.mxu1 %v773_v25  ;;  %392 = vmatpush.bf16.msra.mxu3 %v761_v30  ;;  %v852_v48 = vld [vmem:[#allocation8 + $0x44] sm:$0xf0]  ;;  %v744_v50 = vld [vmem:[#allocation8 + $0xc0] sm:$0xf]  ;;  %v757_v52 = vor.u32 %v869_v44, %v754_v45  ;;  %v851_v53 = vld [vmem:[#allocation8 + $0x44] sm:$0xf] }
  0x24   :  { %v868_v51 = vld [vmem:[#allocation8 + $0xc4] sm:$0xf0]  ;;  %v682_v54 = vld [vmem:[#allocation8 + $0x48] sm:$0xf0]  ;;  %v681_v55 = vor.u32 %v852_v48, %v680_v47  ;;  %v867_v56 = vld [vmem:[#allocation8 + $0xc4] sm:$0xf] }
  0x25   :  { %379 = vmatpush.bf16.msra.mxu2 %v689_v42  ;;  %v746_v57 = vld [vmem:[#allocation8 + $0xc8] sm:$0xf0]  ;;  %v745_v58 = vor.u32 %v868_v51, %v744_v50  ;;  %v685_v59 = vor.u32 %v851_v53, %v682_v54  ;;  %v672_v61 = vld [vmem:[#allocation8 + $0x30] sm:$0xf]  ;;  %v850_v62 = vld [vmem:[#allocation8 + $0x34] sm:$0xf0] }
  0x26   :  { %406 = vmatpush.bf16.msrb.mxu0 %v701_v34  ;;  %v749_v60 = vor.u32 %v867_v56, %v746_v57  ;;  %v736_v63 = vld [vmem:[#allocation8 + $0xb0] sm:$0xf]  ;;  %v673_v0 = vor.u32 %v850_v62, %v672_v61  ;;  %v866_v1 = vld [vmem:[#allocation8 + $0xb4] sm:$0xf0]  ;;  %v849_v2 = vld [vmem:[#allocation8 + $0x34] sm:$0xf] }
  0x27   :  { %420 = vmatpush.bf16.msrb.mxu1 %v765_v38  ;;  %393 = vmatpush.bf16.msra.mxu3 %v753_v46  ;;  %v674_v3 = vld [vmem:[#allocation8 + $0x38] sm:$0xf0]  ;;  %v737_v4 = vor.u32 %v866_v1, %v736_v63  ;;  %v865_v6 = vld [vmem:[#allocation8 + $0xb4] sm:$0xf]  ;;  %v664_v9 = vld [vmem:[#allocation8 + $0x20] sm:$0xf] }
  0x28   :  { %v677_v5 = vor.u32 %v849_v2, %v674_v3  ;;  %v738_v7 = vld [vmem:[#allocation8 + $0xb8] sm:$0xf0]  ;;  %v848_v10 = vld [vmem:[#allocation8 + $0x24] sm:$0xf0]  ;;  %v728_v12 = vld [vmem:[#allocation8 + $0xa0] sm:$0xf] }
  0x29   :  { %380 = vmatpush.bf16.msra.mxu2 %v681_v55  ;;  %v741_v8 = vor.u32 %v865_v6, %v738_v7  ;;  %v665_v11 = vor.u32 %v848_v10, %v664_v9  ;;  %v864_v13 = vld [vmem:[#allocation8 + $0xa4] sm:$0xf0]  ;;  %v847_v14 = vld [vmem:[#allocation8 + $0x24] sm:$0xf]  ;;  %v666_v16 = vld [vmem:[#allocation8 + $0x28] sm:$0xf0] }
  0x2a   :  { %407 = vmatpush.bf16.msrb.mxu0 %v693_v49  ;;  %v729_v15 = vor.u32 %v864_v13, %v728_v12  ;;  %v863_v17 = vld [vmem:[#allocation8 + $0xa4] sm:$0xf]  ;;  %v730_v18 = vld [vmem:[#allocation8 + $0xa8] sm:$0xf0]  ;;  %v669_v19 = vor.u32 %v847_v14, %v666_v16  ;;  %v656_v21 = vld [vmem:[#allocation8 + $0x10] sm:$0xf] }
  0x2b   :  { %421 = vmatpush.bf16.msrb.mxu1 %v757_v52  ;;  %394 = vmatpush.bf16.msra.mxu3 %v745_v58  ;;  %v733_v20 = vor.u32 %v863_v17, %v730_v18  ;;  %v846_v22 = vld [vmem:[#allocation8 + $0x14] sm:$0xf0]  ;;  %v720_v23 = vld [vmem:[#allocation8 + $0x90] sm:$0xf]  ;;  %v845_v26 = vld [vmem:[#allocation8 + $0x14] sm:$0xf] }
  0x2c   :  { %v657_v24 = vor.u32 %v846_v22, %v656_v21  ;;  %v862_v25 = vld [vmem:[#allocation8 + $0x94] sm:$0xf0]  ;;  %v658_v27 = vld [vmem:[#allocation8 + $0x18] sm:$0xf0]  ;;  %v861_v30 = vld [vmem:[#allocation8 + $0x94] sm:$0xf] }
  0x2d   :  { %381 = vmatpush.bf16.msra.mxu2 %v673_v0  ;;  %v721_v28 = vor.u32 %v862_v25, %v720_v23  ;;  %v661_v29 = vor.u32 %v845_v26, %v658_v27  ;;  %v722_v31 = vld [vmem:[#allocation8 + $0x98] sm:$0xf0]  ;;  %v648_v33 = vld [vmem:[#allocation8] sm:$0xf]  ;;  %v844_v34 = vld [vmem:[#allocation8 + $0x4] sm:$0xf0] }
  0x2e   :  { %408 = vmatpush.bf16.msrb.mxu0 %v685_v59  ;;  %v725_v32 = vor.u32 %v861_v30, %v722_v31  ;;  %v712_v35 = vld [vmem:[#allocation8 + $0x80] sm:$0xf]  ;;  %v649_v36 = vor.u32 %v844_v34, %v648_v33  ;;  %v860_v37 = vld [vmem:[#allocation8 + $0x84] sm:$0xf0]  ;;  %v843_v38 = vld [vmem:[#allocation8 + $0x4] sm:$0xf] }
  0x2f   :  { %422 = vmatpush.bf16.msrb.mxu1 %v749_v60  ;;  %395 = vmatpush.bf16.msra.mxu3 %v737_v4  ;;  %v650_v39 = vld [vmem:[#allocation8 + $0x8] sm:$0xf0]  ;;  %v713_v40 = vor.u32 %v860_v37, %v712_v35  ;;  %v859_v42 = vld [vmem:[#allocation8 + $0x84] sm:$0xf]  ;;  %v890_v45 = vld [vmem:[#allocation10 + $0x78] sm:$0xff]  ;;  %s609_s11 = sshll.u32 %s1150_s7, 4  ;;  %s610_s11 = int_to_ptr.hbm [resolvable:$true] %s609_s11 }
  0x30   :  { %v653_v41 = vor.u32 %v843_v38, %v650_v39  ;;  %v714_v43 = vld [vmem:[#allocation8 + $0x88] sm:$0xf0]  ;;  %v882_v46 = vld [vmem:[#allocation10 + $0x38] sm:$0xff]  ;;  %v889_v47 = vld [vmem:[#allocation10 + $0x70] sm:$0xff] }
  0x31   :  { %382 = vmatpush.bf16.msra.mxu2 %v665_v11  ;;  %v717_v44 = vor.u32 %v859_v42, %v714_v43  ;;  %v881_v48 = vld [vmem:[#allocation10 + $0x30] sm:$0xff]  ;;  %v888_v49 = vld [vmem:[#allocation10 + $0x68] sm:$0xff]  ;;  %v887_v50 = vld [vmem:[#allocation10 + $0x60] sm:$0xff] }
  0x32   :  { %409 = vmatpush.bf16.msrb.mxu0 %v677_v5  ;;  %v110_v51 = vld [vmem:[#allocation7] sm:$0x3]  ;;  %v880_v4 = vld [vmem:[#allocation10 + $0x28] sm:$0xff]  ;;  %v879_v6 = vld [vmem:[#allocation10 + $0x20] sm:$0xff] }
  0x33   :  { %423 = vmatpush.bf16.msrb.mxu1 %v741_v8  ;;  %396 = vmatpush.bf16.msra.mxu3 %v729_v15  ;;  %v112_v54 = vperm.slane %v110_v51, 0  ;;  %v113_v55 = vperm.slane %v110_v51, 1  ;;  %v886_v5 = vld [vmem:[#allocation10 + $0x58] sm:$0xff]  ;;  %v885_v7 = vld [vmem:[#allocation10 + $0x50] sm:$0xff]  ;;  %v884_v9 = vld [vmem:[#allocation10 + $0x48] sm:$0xff] }
  0x34   :  { %v878_v8 = vld [vmem:[#allocation10 + $0x18] sm:$0xff]  ;;  %v877_v10 = vld [vmem:[#allocation10 + $0x10] sm:$0xff]  ;;  %v883_v11 = vld [vmem:[#allocation10 + $0x40] sm:$0xff] }
  0x35   :  { %383 = vmatpush.bf16.msra.mxu2 %v657_v24  ;;  %v876_v12 = vld [vmem:[#allocation10 + $0x8] sm:$0xff]  ;;  %v875_v13 = vld [vmem:[#allocation10] sm:$0xff]  ;;  %v211_v14 = vld [vmem:[%s1147_s4] sm:$0x3] }
  0x36   :  { %410 = vmatpush.bf16.msrb.mxu0 %v669_v19  ;;  %v214_v16 = vperm.slane %v211_v14, 1  ;;  %v901_v39 = vld [vmem:[%s1149_s6] ss:$0 sm:$0xff] }
  0x37   :  { %424 = vmatpush.bf16.msrb.mxu1 %v733_v20  ;;  %397 = vmatpush.bf16.msra.mxu3 %v721_v28  ;;  %v213_v20 = vperm.slane %v211_v14, 0 }
  0x39   :  { %384 = vmatpush.bf16.msra.mxu2 %v649_v36 }
  0x3a   :  { %411 = vmatpush.bf16.msrb.mxu0 %v661_v29 }
  0x3b   :  { %425 = vmatpush.bf16.msrb.mxu1 %v725_v32  ;;  %398 = vmatpush.bf16.msra.mxu3 %v713_v40 }
  0x3d   :  { %571 = vmatpush.bf16.msrb.mxu2 %v882_v46 }
  0x3e   :  { %412 = vmatpush.bf16.msrb.mxu0 %v653_v41 }
  0x3f   :  { %426 = vmatpush.bf16.msrb.mxu1 %v717_v44  ;;  %585 = vmatpush.bf16.msrb.mxu3 %v890_v45 }
  0x41   :  { %572 = vmatpush.bf16.msrb.mxu2 %v881_v48 }
  0x43   :  { %586 = vmatpush.bf16.msrb.mxu3 %v889_v47 }
  0x45   :  { %573 = vmatpush.bf16.msrb.mxu2 %v880_v4 }
  0x47   :  { %587 = vmatpush.bf16.msrb.mxu3 %v888_v49 }
  0x49   :  { %574 = vmatpush.bf16.msrb.mxu2 %v879_v6 }
  0x4b   :  { %588 = vmatpush.bf16.msrb.mxu3 %v887_v50 }
  0x4d   :  { %575 = vmatpush.bf16.msrb.mxu2 %v878_v8 }
  0x4f   :  { %589 = vmatpush.bf16.msrb.mxu3 %v886_v5 }
  0x51   :  { %576 = vmatpush.bf16.msrb.mxu2 %v877_v10 }
  0x53   :  { %590 = vmatpush.bf16.msrb.mxu3 %v885_v7 }
  0x55   :  { %577 = vmatpush.bf16.msrb.mxu2 %v876_v12 }
  0x57   :  { %591 = vmatpush.bf16.msrb.mxu3 %v884_v9 }
  0x59   :  { %578 = vmatpush.bf16.msrb.mxu2 %v875_v13 }
  0x5b   :  { %592 = vmatpush.bf16.msrb.mxu3 %v883_v11 }
  0x9e   :  { %v154_v52 = vpop.f32.mrf.mxu0 }
  0x9f   :  { %v168_v53 = vpop.f32.mrf.mxu1  ;;  %v155_v56 = vadd.f32 %v154_v52, %v112_v54 }
  0xa0   :  { %v169_v57 = vadd.f32 %v168_v53, %v113_v55 }
  0xa1   :  { %v173_v62 = vmax.f32 %v155_v56, 0.0 }
  0xa2   :  { %v174_v0 = vmax.f32 %v169_v57, 0.0 }
  0xa6   :  { %v156_v58 = vpop.f32.mrf.mxu0 }
  0xa7   :  { %v157_v59 = vadd.f32 %v156_v58, %v112_v54  ;;  %v170_v60 = vpop.f32.mrf.mxu1 }
  0xa8   :  { %v171_v61 = vadd.f32 %v170_v60, %v113_v55 }
  0xa9   :  { %v175_v63 = vmax.f32 %v157_v59, 0.0 }
  0xaa   :  { %v176_v1 = vmax.f32 %v171_v61, 0.0 }
  0xab   :  { %v177_v2 = vpack.c.bf16 %v175_v63, %v173_v62 }
  0xac   :  { %v178_v3 = vpack.c.bf16 %v176_v1, %v174_v0 }
  0xad   :  { %385 = vmatmul.bf16.vlgmr.msra.gmra.mxu2 %v177_v2  ;;  %413 = vmatmul.bf16.vlgmr.msrb.gmra.mxu0 %v177_v2 }
  0xae   :  { %399 = vmatmul.bf16.vlgmr.msra.gmra.mxu3 %v178_v3  ;;  %427 = vmatmul.bf16.vlgmr.msrb.gmra.mxu1 %v178_v3 }
 0x12a   :  { %v414_v15 = vpop.f32.mrf.mxu0 }
 0x12b   :  { %v428_v17 = vpop.f32.mrf.mxu1  ;;  %v415_v18 = vadd.f32 %v414_v15, %v214_v16 }
 0x12d   :  { %v429_v23 = vadd.f32 %v428_v17, %v415_v18 }
 0x12f   :  { %v434_v28 = vmax.f32 %v429_v23, 0.0 }
 0x130   :  { %v386_v19 = vpop.f32.mrf.mxu2 }
 0x131   :  { %v400_v21 = vpop.f32.mrf.mxu3  ;;  %v387_v26 = vadd.f32 %v386_v19, %v213_v20 }
 0x132   :  { %v416_v22 = vpop.f32.mrf.mxu0 }
 0x133   :  { %v417_v24 = vadd.f32 %v416_v22, %v214_v16  ;;  %v430_v25 = vpop.f32.mrf.mxu1  ;;  %v401_v31 = vadd.f32 %v400_v21, %v387_v26 }
 0x135   :  { %v431_v27 = vadd.f32 %v430_v25, %v417_v24  ;;  %v433_v36 = vmax.f32 %v401_v31, 0.0 }
 0x137   :  { %v436_v29 = vmax.f32 %v431_v27, 0.0 }
 0x138   :  { %v388_v30 = vpop.f32.mrf.mxu2 }
 0x139   :  { %v438_v32 = vpack.c.bf16 %v436_v29, %v434_v28  ;;  %v389_v33 = vadd.f32 %v388_v30, %v213_v20  ;;  %v402_v34 = vpop.f32.mrf.mxu3 }
 0x13b   :  { %v403_v35 = vadd.f32 %v402_v34, %v389_v33  ;;  %593 = vmatmul.bf16.vlgmr.msrb.gmra.mxu3 %v438_v32 }
 0x13d   :  { %v435_v37 = vmax.f32 %v403_v35, 0.0 }
 0x13f   :  { %v437_v38 = vpack.c.bf16 %v435_v37, %v433_v36 }
 0x141   :  { %579 = vmatmul.bf16.vlgmr.msrb.gmra.mxu2 %v437_v38 }
 0x1be   :  { %v594_v40 = vpop.f32.mrf.mxu3 }
 0x1c4   :  { %v580_v41 = vpop.f32.mrf.mxu2 }
 0x1c5   :  { %v581_v42 = vadd.f32 %v901_v39, %v580_v41 }
 0x1c6   :  { %v596_v46 = vpop.f32.mrf.mxu3 }
 0x1c7   :  { %v595_v43 = vadd.f32 %v594_v40, %v581_v42 }
 0x1c9   :  { %902 = vtanh.f32 %v595_v43 }
 0x1cc   :  { %v582_v44 = vpop.f32.mrf.mxu2 }
 0x1cd   :  { %v583_v45 = vadd.f32 %v901_v39, %v582_v44 }
 0x1cf   :  { %v903_v47 = vpop.eup %902  ;;  %v597_v48 = vadd.f32 %v596_v46, %v583_v45 }
 0x1d0   :  { %601 = vst [vmem:[#allocation11] sm:$0xff] %v903_v47 }
 0x1d1   :  { %904 = vtanh.f32 %v597_v48 }
 0x1d7   :  { %v905_v49 = vpop.eup %904 }
 0x1d8   :  { %602 = vst [vmem:[#allocation11 + $0x8] sm:$0xff] %v905_v49 }
 0x1d9   :  { %615 = dma.vmem_to_hbm [thread:$0]  %s608_s29, 256, %s610_s11, [#allocation4], %s1059_s9, %s1059_s9, %s1060_s10  }
 0x1da   :  { %1056 = dma.done.wait [#allocation4], 256  }
 0x1db   :  { %1057 = vsyncadd [#allocation4], 4294967040 }
 0x1dc   :  { %620 = vsyncpa [#allocation3], 1 }
 0x1dd   :  { %621 = vsyncpa [#allocation6], 1 }
 0x1de   :  { %622 = vsyncpa [#allocation9], 1 }
 0x1df   :  { %623 = vsyncpa [#allocation4], 1 }

</bundles_post_ra>
